<compile_context>
chip_gen: v7x
topology: tpu7x:2x2x1
jax: 0.10.0
libtpu: 0.0.40
codegen_flags: <defaults>
</compile_context>

<pallas_src>
import functools

import jax
import jax.numpy as jnp
import numpy as np
from jax.experimental import pallas as pl
from jax.experimental.pallas import tpu as pltpu


def _head_kernel(xpad_ref, xres_ref, wvq_ref, bvq_ref, keyp_ref, out_ref,
                 *, Ci, T, K, P, pad):
    """One grid step = one attention head.

    xpad_ref : (C, Tp*P)      zero-padded input, lane-major (Tp = T + 2*pad)
    xres_ref : (1, Ci, T*P)   residual slice of x for this head
    wvq_ref  : (1, 2*Ci, C)   stacked [Wv; Wq] 1x1x1-conv weights
    bvq_ref  : (1, 2*Ci, 1)   stacked [bv; bq]
    keyp_ref : (1, K, 2*Ci)   key-embedded nodes, zero-padded over the V rows
    out_ref  : (1, Ci, T*P)
    """
    x_all = xpad_ref[...]                                    # (C, Tp*P)

    # one MXU call -> value AND query embeddings of every padded frame
    vq = jnp.dot(wvq_ref[0], x_all,
                 preferred_element_type=jnp.float32) + bvq_ref[0]   # (2Ci, Tp*P)

    # attention logits of the K nodes vs. the query embedding of every
    # (unpadded) frame; keyp has zeros over the value rows, so only the query
    # half of vq contributes.
    vq_mid = vq[:, pad * P:(pad + T) * P]                    # (2Ci, T*P) lane slice
    scores = jnp.dot(keyp_ref[0], vq_mid,
                     preferred_element_type=jnp.float32)     # (K, T*P)

    m = jnp.max(scores, axis=0, keepdims=True)
    e = jnp.exp(scores - m)
    alpha = e * pl.reciprocal(jnp.sum(e, axis=0, keepdims=True), approx=True)

    v = vq[:Ci, :]                                           # (Ci, Tp*P) value rows

    # window accumulation: y[:, s] = sum_t alpha[t, s] * v[:, s + t]
    # (static unrolled loop over shifted, 128-aligned lane slices)
    acc = xres_ref[0]                                        # start from residual
    for t in range(K):
        acc = acc + alpha[t:t + 1, :] * v[:, t * P:(t + T) * P]

    out_ref[0] = acc.astype(out_ref.dtype)


def local_node_attention_multihead(x, params, window_size):
    """x: (B, C, T, H, W) float32 -> (B, C, T, H, W) float32."""
    B, C, T, H, W = x.shape
    K = window_size
    N = params["Wq"].shape[0]
    Ci = C // N
    P = B * H * W
    pad = (K - 1) // 2
    Tp = T + 2 * pad

    # lane-major layout: (C, T, P) with P = B*H*W mapped to lanes.
    xf = jnp.transpose(x, (1, 2, 0, 3, 4)).reshape(C, T, P).astype(jnp.float32)
    x_pad = jnp.pad(xf, ((0, 0), (pad, pad), (0, 0))).reshape(C, Tp * P)
    x_res = xf.reshape(N, Ci, T * P)                         # per-head residual

    # stack the value and query embeddings into one full-sublane weight block.
    wvq = jnp.concatenate([params["Wv"], params["Wq"]], axis=1).astype(jnp.float32)
    bvq = jnp.concatenate([params["bv"], params["bq"]],
                          axis=1)[..., None].astype(jnp.float32)

    # key embedding of the tiny fixed node set (constant -> plain-JAX glue),
    # zero-padded over the value rows so keyp @ vq == keys @ q.
    keys = (jnp.einsum("nkc,ndc->nkd", params["nodes"], params["Wk"])
            + params["bk"][:, None, :]).astype(jnp.float32)
    keyp = jnp.concatenate([jnp.zeros((N, K, Ci), jnp.float32), keys], axis=2)

    kernel = functools.partial(_head_kernel, Ci=Ci, T=T, K=K, P=P, pad=pad)

    out = pl.pallas_call(
        kernel,
        out_shape=jax.ShapeDtypeStruct((N, Ci, T * P), jnp.float32),
        grid_spec=pltpu.PrefetchScalarGridSpec(
            num_scalar_prefetch=0,
            grid=(N,),
            in_specs=[
                pl.BlockSpec((C, Tp * P), lambda h: (0, 0)),        # padded x (resident)
                pl.BlockSpec((1, Ci, T * P), lambda h: (h, 0, 0)),  # residual slice
                pl.BlockSpec((1, 2 * Ci, C), lambda h: (h, 0, 0)),  # [Wv; Wq]
                pl.BlockSpec((1, 2 * Ci, 1), lambda h: (h, 0, 0)),  # [bv; bq]
                pl.BlockSpec((1, K, 2 * Ci), lambda h: (h, 0, 0)),  # padded keys
            ],
            out_specs=pl.BlockSpec((1, Ci, T * P), lambda h: (h, 0, 0)),
        ),
        compiler_params=pltpu.CompilerParams(
            dimension_semantics=("parallel",)),
    )(x_pad, x_res, wvq, bvq, keyp)

    # (N, Ci, T*P) -> (B, C, T, H, W); output channel = head*Ci + inner_channel
    z = (out.reshape(N, Ci, T, B, H, W)
            .transpose(3, 0, 1, 2, 4, 5)
            .reshape(B, C, T, H, W))
    return z


def reference_forward(x, params, K):
    """Pure-JAX reference matching the module semantics (eval mode)."""
    B, C, T, H, W = x.shape
    N = params["Wq"].shape[0]
    pad = (K - 1) // 2
    x_pad = jnp.pad(x, ((0, 0), (0, 0), (pad, pad), (0, 0), (0, 0)))
    heads = []
    for h in range(N):
        Wq, bq = params["Wq"][h], params["bq"][h]
        Wv, bv = params["Wv"][h], params["bv"][h]
        key = params["nodes"][h] @ params["Wk"][h].T + params["bk"][h]   # (K, Ci)
        q = jnp.einsum("dc,bcthw->bdthw", Wq, x) + bq[None, :, None, None, None]
        v = jnp.einsum("dc,bcthw->bdthw", Wv, x_pad) + bv[None, :, None, None, None]
        ys = []
        for s in range(T):
            scores = jnp.einsum("kd,bdhw->bkhw", key, q[:, :, s])
            alpha = jax.nn.softmax(scores, axis=1)
            ys.append(jnp.einsum("bkhw,bdkhw->bdhw", alpha, v[:, :, s:s + K]))
        heads.append(jnp.stack(ys, axis=2))
    return jnp.concatenate(heads, axis=1) + x


def init_params(key, C, N, K):
    Ci = C // N
    ks = jax.random.split(key, 7)
    return dict(
        Wq=0.2 * jax.random.normal(ks[0], (N, Ci, C), jnp.float32),
        bq=0.1 * jax.random.normal(ks[1], (N, Ci), jnp.float32),
        Wk=0.2 * jax.random.normal(ks[2], (N, Ci, Ci), jnp.float32),
        bk=0.1 * jax.random.normal(ks[3], (N, Ci), jnp.float32),
        Wv=0.2 * jax.random.normal(ks[4], (N, Ci, C), jnp.float32),
        bv=0.1 * jax.random.normal(ks[5], (N, Ci), jnp.float32),
        # stand-in for utils.generate_centroids(K, Ci): deterministic pseudo-random nodes
        nodes=jax.random.normal(ks[6], (N, K, Ci), jnp.float32),
    )


if __name__ == "__main__":
    # input_shape = (C, T, H, W) = (8, 5, 8, 8), window_size = 3 (odd), n_heads = 2
    B, C, T, H, W = 2, 8, 5, 8, 8
    K, N = 3, 2

    key = jax.random.PRNGKey(0)
    kx, kp = jax.random.split(key)
    x = jax.random.normal(kx, (B, C, T, H, W), jnp.float32)
    params = init_params(kp, C, N, K)

    z = local_node_attention_multihead(x, params, K)
    z = jax.block_until_ready(z)

    # tolerance slightly relaxed vs 1e-3 because of pl.reciprocal(approx=True)
    z_ref = reference_forward(x, params, K)
    np.testing.assert_allclose(np.asarray(z), np.asarray(z_ref), rtol=5e-3, atol=5e-3)
    print("KERNEL_OK")
</pallas_src>

<mosaic_0001>
module attributes {stable_mosaic.version = 11 : i64} {
  func.func @_head_kernel(%arg0: i32, %arg1: memref<8x896xf32, #tpu.memory_space<vmem>>, %arg2: memref<1x4x640xf32, #tpu.memory_space<vmem>>, %arg3: memref<1x8x8xf32, #tpu.memory_space<vmem>>, %arg4: memref<1x8x1xf32, #tpu.memory_space<vmem>>, %arg5: memref<1x3x8xf32, #tpu.memory_space<vmem>>, %arg6: memref<1x4x640xf32, #tpu.memory_space<vmem>>) attributes {dimension_semantics = [#tpu.dimension_semantics<parallel>], iteration_bounds = array<i64: 2>, scalar_prefetch = 0 : i64, scratch_operands = 0 : i64, tpu.core_type = #tpu.core_type<tc>, window_params = [{pipeline_mode = #tpu.pipeline_mode<synchronous>, transform_indices = @transform_0, window_bounds = array<i64: 8, 896>}, {transform_indices = @transform_1, window_bounds = array<i64: 1, 4, 640>}, {transform_indices = @transform_2, window_bounds = array<i64: 1, 8, 8>}, {transform_indices = @transform_3, window_bounds = array<i64: 1, 8, 1>}, {transform_indices = @transform_4, window_bounds = array<i64: 1, 3, 8>}, {transform_indices = @transform_5, window_bounds = array<i64: 1, 4, 640>}]} {
    %c0 = arith.constant 0 : index
    %c0_0 = arith.constant 0 : index
    %0 = vector.load %arg1[%c0, %c0_0] : memref<8x896xf32, #tpu.memory_space<vmem>>, vector<8x896xf32>
    %c0_1 = arith.constant 0 : index
    %c0_2 = arith.constant 0 : index
    %c0_3 = arith.constant 0 : index
    %1 = vector.load %arg3[%c0_1, %c0_2, %c0_3] : memref<1x8x8xf32, #tpu.memory_space<vmem>>, vector<1x8x8xf32>
    %2 = vector.shape_cast %1 : vector<1x8x8xf32> to vector<8x8xf32>
    %cst = arith.constant dense<0.000000e+00> : vector<8x896xf32>
    %3 = tpu.matmul %2, %0, %cst {dimension_numbers = #tpu.dot_dimension_numbers<[1], [0], [0], [1], [0, 0, 1, 1], [], []>} : vector<8x8xf32>, vector<8x896xf32>, vector<8x896xf32> -> vector<8x896xf32>
    %c0_4 = arith.constant 0 : index
    %c0_5 = arith.constant 0 : index
    %c0_6 = arith.constant 0 : index
    %4 = vector.load %arg4[%c0_4, %c0_5, %c0_6] : memref<1x8x1xf32, #tpu.memory_space<vmem>>, vector<1x8x1xf32>
    %5 = vector.shape_cast %4 : vector<1x8x1xf32> to vector<8x1xf32>
    %6 = vector.broadcast %5 : vector<8x1xf32> to vector<8x896xf32>
    %7 = arith.addf %3, %6 : vector<8x896xf32>
    %8 = vector.extract_strided_slice %7 {offsets = [0, 128], sizes = [8, 640], strides = [1, 1]} : vector<8x896xf32> to vector<8x640xf32>
    %c0_7 = arith.constant 0 : index
    %c0_8 = arith.constant 0 : index
    %c0_9 = arith.constant 0 : index
    %9 = vector.load %arg5[%c0_7, %c0_8, %c0_9] : memref<1x3x8xf32, #tpu.memory_space<vmem>>, vector<1x3x8xf32>
    %10 = vector.shape_cast %9 : vector<1x3x8xf32> to vector<3x8xf32>
    %cst_10 = arith.constant dense<0.000000e+00> : vector<3x640xf32>
    %11 = tpu.matmul %10, %8, %cst_10 {dimension_numbers = #tpu.dot_dimension_numbers<[1], [0], [0], [1], [0, 0, 1, 1], [], []>} : vector<3x8xf32>, vector<8x640xf32>, vector<3x640xf32> -> vector<3x640xf32>
    %cst_11 = arith.constant dense<0xFF800000> : vector<640xf32>
    %12 = vector.multi_reduction <maximumf>, %11, %cst_11 [0] : vector<3x640xf32> to vector<640xf32>
    %13 = vector.shape_cast %12 : vector<640xf32> to vector<1x640xf32>
    %14 = vector.broadcast %13 : vector<1x640xf32> to vector<3x640xf32>
    %15 = arith.subf %11, %14 : vector<3x640xf32>
    %16 = math.exp %15 : vector<3x640xf32>
    %cst_12 = arith.constant dense<0.000000e+00> : vector<640xf32>
    %17 = vector.multi_reduction <add>, %16, %cst_12 [0] : vector<3x640xf32> to vector<640xf32>
    %18 = vector.shape_cast %17 : vector<640xf32> to vector<1x640xf32>
    %19 = tpu.reciprocal %18 {approx = true} : vector<1x640xf32> -> vector<1x640xf32>
    %20 = vector.broadcast %19 : vector<1x640xf32> to vector<3x640xf32>
    %21 = arith.mulf %16, %20 : vector<3x640xf32>
    %22 = vector.extract_strided_slice %7 {offsets = [0, 0], sizes = [4, 896], strides = [1, 1]} : vector<8x896xf32> to vector<4x896xf32>
    %c0_13 = arith.constant 0 : index
    %c0_14 = arith.constant 0 : index
    %c0_15 = arith.constant 0 : index
    %23 = vector.load %arg2[%c0_13, %c0_14, %c0_15] : memref<1x4x640xf32, #tpu.memory_space<vmem>>, vector<1x4x640xf32>
    %24 = vector.shape_cast %23 : vector<1x4x640xf32> to vector<4x640xf32>
    %25 = vector.extract_strided_slice %21 {offsets = [0, 0], sizes = [1, 640], strides = [1, 1]} : vector<3x640xf32> to vector<1x640xf32>
    %26 = vector.extract_strided_slice %22 {offsets = [0, 0], sizes = [4, 640], strides = [1, 1]} : vector<4x896xf32> to vector<4x640xf32>
    %27 = vector.broadcast %25 : vector<1x640xf32> to vector<4x640xf32>
    %28 = arith.mulf %27, %26 : vector<4x640xf32>
    %29 = arith.addf %24, %28 : vector<4x640xf32>
    %30 = vector.extract_strided_slice %21 {offsets = [1, 0], sizes = [1, 640], strides = [1, 1]} : vector<3x640xf32> to vector<1x640xf32>
    %31 = vector.extract_strided_slice %22 {offsets = [0, 128], sizes = [4, 640], strides = [1, 1]} : vector<4x896xf32> to vector<4x640xf32>
    %32 = vector.broadcast %30 : vector<1x640xf32> to vector<4x640xf32>
    %33 = arith.mulf %32, %31 : vector<4x640xf32>
    %34 = arith.addf %29, %33 : vector<4x640xf32>
    %35 = vector.extract_strided_slice %21 {offsets = [2, 0], sizes = [1, 640], strides = [1, 1]} : vector<3x640xf32> to vector<1x640xf32>
    %36 = vector.extract_strided_slice %22 {offsets = [0, 256], sizes = [4, 640], strides = [1, 1]} : vector<4x896xf32> to vector<4x640xf32>
    %37 = vector.broadcast %35 : vector<1x640xf32> to vector<4x640xf32>
    %38 = arith.mulf %37, %36 : vector<4x640xf32>
    %39 = arith.addf %34, %38 : vector<4x640xf32>
    %c0_16 = arith.constant 0 : index
    %c0_17 = arith.constant 0 : index
    %c0_18 = arith.constant 0 : index
    %40 = vector.load %arg6[%c0_16, %c0_17, %c0_18] : memref<1x4x640xf32, #tpu.memory_space<vmem>>, vector<1x4x640xf32>
    %41 = vector.shape_cast %40 : vector<1x4x640xf32> to vector<4x640xf32>
    %42 = vector.shape_cast %39 : vector<4x640xf32> to vector<1x4x640xf32>
    tpu.vector_store %arg6[%c0_16, %c0_17, %c0_18], %42 {strides = array<i32>} : memref<1x4x640xf32, #tpu.memory_space<vmem>>, vector<1x4x640xf32>,
    return
  }
  func.func @transform_0(%arg0: i32) -> (i32, i32) {
    %c0_i32 = arith.constant 0 : i32
    %c0_i32_0 = arith.constant 0 : i32
    %c0_i32_1 = arith.constant 0 : i32
    return %c0_i32, %c0_i32_0 : i32, i32
  }
  func.func @transform_1(%arg0: i32) -> (i32, i32, i32) {
    %c0_i32 = arith.constant 0 : i32
    %c0_i32_0 = arith.constant 0 : i32
    %c0_i32_1 = arith.constant 0 : i32
    return %arg0, %c0_i32, %c0_i32_0 : i32, i32, i32
  }
  func.func @transform_2(%arg0: i32) -> (i32, i32, i32) {
    %c0_i32 = arith.constant 0 : i32
    %c0_i32_0 = arith.constant 0 : i32
    %c0_i32_1 = arith.constant 0 : i32
    return %arg0, %c0_i32, %c0_i32_0 : i32, i32, i32
  }
  func.func @transform_3(%arg0: i32) -> (i32, i32, i32) {
    %c0_i32 = arith.constant 0 : i32
    %c0_i32_0 = arith.constant 0 : i32
    %c0_i32_1 = arith.constant 0 : i32
    return %arg0, %c0_i32, %c0_i32_0 : i32, i32, i32
  }
  func.func @transform_4(%arg0: i32) -> (i32, i32, i32) {
    %c0_i32 = arith.constant 0 : i32
    %c0_i32_0 = arith.constant 0 : i32
    %c0_i32_1 = arith.constant 0 : i32
    return %arg0, %c0_i32, %c0_i32_0 : i32, i32, i32
  }
  func.func @transform_5(%arg0: i32) -> (i32, i32, i32) {
    %c0_i32 = arith.constant 0 : i32
    %c0_i32_0 = arith.constant 0 : i32
    %c0_i32_1 = arith.constant 0 : i32
    return %arg0, %c0_i32, %c0_i32_0 : i32, i32, i32
  }
}

</mosaic_0001>

<bundles_post_ra>
// kernel: tpu_custom_call.1
= control target key start
LH: loop header
LB: loop body
LE: loop exit
PB: predicated region body
PF: predicated region fallthrough
CT: control target
= control target key end

     0   :  { %10 = vsyncpa [#allocation3], 0  ;;  %s1732_s0 = inlined_call_operand.hbm [shape: f32[8,896], index: 0, kind: input, shape index: {}]   ;;  %s1733_s1 = inlined_call_operand.hbm [shape: f32[2,4,640], index: 1, kind: input, shape index: {}]   ;;  %s1734_s2 = inlined_call_operand.vmem [shape: f32[2,8,8], index: 2, kind: input, shape index: {}]   ;;  %s1735_s3 = inlined_call_operand.vmem [shape: f32[2,8,1], index: 3, kind: input, shape index: {}]   ;;  %s1736_s4 = inlined_call_operand.vmem [shape: f32[2,3,8], index: 4, kind: input, shape index: {}]   ;;  %s1737_s5 = inlined_call_operand.hbm [shape: f32[2,4,640], index: 5, kind: output, shape index: {}]  }
   0x1   :  { %11 = vsyncpa [#allocation6], 0 }
   0x2   :  { %13 = vsyncpa [#allocation6 + $0x1], 0 }
   0x3   :  { %14 = vsyncpa [#allocation4], 0 }
   0x4   :  { %16 = vsyncpa [#allocation4 + $0x1], 0  ;;  %s1450_s18 = smov 0   ;;  %s1452_s19 = smov 0  }
   0x5   :  { %s1454_s20 = smov 0   ;;  %s1456_s21 = smov 0  }
   0x6 LB: > { %s1471_s22 = sadd.s32 4294967295, %s1412_s21   ;;  %s1165_s23 = sadd.s32 4294967294, %s1412_s21   ;;  %s1412_s21 = sphi %s1456_s21, %s1761_s21   ;;  %s1408_s20 = sphi %s1454_s20, %s1760_s20   ;;  %s1404_s19 = sphi %s1452_s19, %s1759_s19   ;;  %s1400_s18 = sphi %s1450_s18, %s1758_s18  }
   0x7   : > { %p63_p0 = scmp.ne.s32.totalorder %s1404_s19, %s1400_s18  ;;  %p1738_p1 = scmp.eq.s32.totalorder %s1471_s22, 0 }
   0x8   : > { %p171_p3 = scmp.eq.s32.totalorder %s1165_s23, 1  ;;  %p1166_p5 = scmp.ge.s32.totalorder %s1412_s21, 1 }
   0x9   : > { %p1480_p4 = por %p1738_p1, %p63_p0  ;;  %p178_p7 = scmp.lt.s32.totalorder %s1412_s21, 3 }
   0xa   : > { %p1485_p6 = por %p171_p3, %p63_p0  ;;  %s1414_s27 = smov [#allocation2]  }
   0xb   : > { %s1741_s24 = scalar_select %p1480_p4, 1, 0 }
   0xc   : > { %s1742_s25 = scalar_select %p1485_p6, 1, 0 }
   0xd   : > { %p1490_p8 = pnand %p1166_p5, %p178_p7  ;;  %s191_s28 = sshll.u32 %s1414_s27, 4  ;;  %s192_s28 = int_to_ptr.vmem [resolvable:$true] %s191_s28 }
   0xe   : > { %s1498_s29 = sadd.s32 1, %s1412_s21   ;;  %s50_s8 = sadd.s32 1, %s1408_s20 }
   0xf   : > { %s1743_s26 = scalar_select %p1490_p8, 1, 0 }
  0x10   : > { %p1211_p10 = pneg %p1490_p8  ;;  %s47_s6 = ssub.s32 %s1412_s21, %s1498_s29 }
  0x11   : > { %p1508_p12 = scmp.eq.s32.totalorder %s47_s6, 0  ;;  %s1284_s11 = scalar_lea.hbm %s1732_s0, 896 }
  0x12   : > { %p1502_p11 = pnand %p1211_p10, %p1738_p1  ;;  %p1285_p0 = scmp.ne.s32.totalorder %s1732_s0, %s1284_s11 }
  0x13   : > { %s1745_s7 = scalar_select %p1508_p12, 1, 0 }
  0x14   : > { %p1286_p3 = pneg %p1502_p11  ;;  %p1291_p10 = scmp.lt.u32.totalorder %s1284_s11, %s1732_s0 }
  0x16   : > { %p1287_p5 = pnand %p1286_p3, %p1285_p0 }
  0x18   : > { %p1288_p7 = pneg %p1287_p5 }
  0x1a   : > { %p1293_p9 = pnand %p1291_p10, %p1288_p7 }
  0x1c   : > { %1296 = shalt.err (!%p1293_p9)
}
  0x1d   : > { %s1297_s16 = scalar_lea.vmem %s192_s28, 896  ;;  %p1305_p6 = scmp.lt.s32.totalorder %s192_s28, %s192_s28 }
  0x1e   : > { %p1298_p1 = scmp.ne.s32.totalorder %s192_s28, %s1297_s16  ;;  %p1306_p4 = scmp.lt.s32.totalorder %s1297_s16, %s1297_s16 }
  0x20   : > { %p1300_p2 = pnand %p1298_p1, %p1286_p3  ;;  %p1307_p8 = por %p1306_p4, %p1305_p6 }
  0x22   : > { %p1301_p13 = pneg %p1300_p2 }
  0x24   : > { %p1308_p12 = pnand %p1307_p8, %p1301_p13 }
  0x26   : > { %1311 = shalt.err (!%p1308_p12)
}
  0x27   : > { %1214 = dma.hbm_to_vmem [thread:$0]  (!%p1502_p11), %s1732_s0, 896, %s192_s28, [#allocation3]  }
  0x28   : > { %p1746_p1 = scmp.ne.s32.totalorder %s1745_s7, 0  ;;  %p58_p2 = scmp.eq.s32.totalorder %s1412_s21, 0 }
  0x29   : > { %p1747_p4 = scmp.ne.s32.totalorder %s1408_s20, %s1404_s19  ;;  %p1748_p6 = scmp.eq.s32.totalorder %s1471_s22, 1 }
  0x2a   : > { %s1534_s27 = scalar_select %p1746_p1, %s1408_s20, %s50_s8  }
  0x2b   : > { %p1542_p8 = por %p1748_p6, %p1747_p4  ;;  %p1224_p9 = scmp.lt.s32.totalorder %s1412_s21, 2 }
  0x2c   : > { %s202_s6 = sand.u32 1, %s1408_s20   ;;  %p1750_p12 = pmov %p1747_p4 }
  0x2d   : > { %s1199_s9 = smul.u32 20, %s202_s6  ;;  %s203_s14 = scalar_lea.sflag [#allocation6], %s202_s6 }
  0x2e   : > { %p59_p13 = por %p58_p2, %p1750_p12  ;;  %s1200_s10 = smul.u32 320, %s1412_s21 }
  0x2f   : > { %s206_s12 = scalar_lea.vmem [#allocation5], %s1199_s9  ;;  %s1317_s23 = scalar_lea.hbm %s1733_s1, 640 }
  0x30   : > { %p1552_p0 = pnand %p1224_p9, %p59_p13  ;;  %s1559_s8 = scalar_lea.hbm %s1733_s1, %s1200_s10 }
  0x31   : > { %s214_s13 = sshll.u32 %s206_s12, 4  ;;  %s1312_s15 = scalar_lea.hbm %s1559_s8, 320  ;;  %s1561_s13 = int_to_ptr.vmem [resolvable:$true] %s214_s13 }
  0x32   : > { %p1313_p11 = scmp.ne.s32.totalorder %s1559_s8, %s1312_s15  ;;  %p1314_p3 = pneg %p1552_p0 }
  0x33   : > { %p1318_p10 = scmp.lt.u32.totalorder %s1559_s8, %s1733_s1  ;;  %p1319_p1 = scmp.lt.u32.totalorder %s1317_s23, %s1312_s15 }
  0x34   : > { %p1315_p5 = pnand %p1314_p3, %p1313_p11  ;;  %p1321_p4 = scmp.lt.u32.totalorder %s1312_s15, %s1559_s8 }
  0x35   : > { %p1320_p2 = por %p1319_p1, %p1318_p10 }
  0x36   : > { %p1316_p7 = pneg %p1315_p5 }
  0x37   : > { %p1322_p6 = por %p1321_p4, %p1320_p2 }
  0x39   : > { %p1323_p9 = pnand %p1322_p6, %p1316_p7 }
  0x3b   : > { %1326 = shalt.err (!%p1323_p9)
}
  0x3c   : > { %s1327_s6 = scalar_lea.vmem %s1561_s13, 320  ;;  %s1415_s9 = smov [#allocation5]  }
  0x3d   : > { %p1328_p12 = scmp.ne.s32.totalorder %s1561_s13, %s1327_s6  ;;  %s1332_s7 = sshll.u32 %s1415_s9, 4  ;;  %s1333_s7 = int_to_ptr.vmem [resolvable:$false] %s1332_s7 }
  0x3e   : > { %s1334_s12 = scalar_lea.vmem %s1333_s7, 640  ;;  %p1335_p5 = scmp.lt.s32.totalorder %s1561_s13, %s1333_s7 }
  0x3f   : > { %p1330_p13 = pnand %p1328_p12, %p1314_p3  ;;  %p1336_p10 = scmp.lt.s32.totalorder %s1334_s12, %s1327_s6 }
  0x41   : > { %p1331_p11 = pneg %p1330_p13  ;;  %p1337_p1 = por %p1336_p10, %p1335_p5 }
  0x43   : > { %p1338_p2 = pnand %p1337_p1, %p1331_p11 }
  0x45   : > { %1341 = shalt.err (!%p1338_p2)
}
  0x46   : > { %1218 = dma.hbm_to_vmem [thread:$0]  (!%p1552_p0), %s1559_s8, 320, %s1561_s13, %s203_s14  }
  0x47   : > { %p1752_p7 = scmp.ne.s32.totalorder %s1743_s26, 0 }
  0x48   : > { %p1753_p3 = scmp.eq.s32.totalorder (!%p1752_p7), %s1471_s22, 0 }
  0x49   : > { %244 = sbr.rel (%p1752_p7) target bundleno = 607 (0x25f), region = 40 }
  0x50   : > { %1387 = dma.done.wait (%p1753_p3), [#allocation3], 896   ;;  %p1754_p4 = pmov %p1753_p3 }
  0x51   : > { %s1595_s15 = sand.u32 1, %s1404_s19   ;;  %p1755_p0 = scmp.ne.s32.totalorder %s1741_s24, 0 }
  0x52   : > { %1389 = vsyncadd (%p1754_p4), [#allocation3], 4294966400  ;;  %s1201_s11 = smul.u32 20, %s1595_s15  ;;  %s251_s16 = scalar_lea.sflag [#allocation6], %s1595_s15 }
  0x54   : > { %s1601_s8 = scalar_lea.vmem [#allocation5], %s1201_s11 }
  0x55   : > { %1391 = dma.done.wait (%p1755_p0), %s251_s16, 320  }
  0x56   : > { %1393 = vsyncadd (%p1755_p0), %s251_s16, 4294966976  ;;  %p293_p6 = scmp.lt.s32.totalorder %s1471_s22, 1  ;;  %v1416_v0 = vmov 0.0   ;;  %v1417_v1 = vmov 0   ;;  %v306_v2 = vld [vmem:[#allocation2 + $0x8] sm:$0xff]  ;;  %v308_v3 = vld [vmem:[#allocation2 + $0x18] sm:$0xff] }
  0x57   : > { %387 = vmatprep.mubr.f32.mxu0 %v1416_v0  ;;  %458 = vmatprep.mubr.f32.mxu1 %v1416_v0  ;;  %v305_v4 = vld [vmem:[#allocation2] sm:$0xff]  ;;  %vm319_vm0 = vcmask 64512   ;;  %v307_v5 = vld [vmem:[#allocation2 + $0x10] sm:$0xff]  ;;  %v310_v7 = vld [vmem:[#allocation2 + $0x28] sm:$0xff]  ;;  %vm1418_vm1 = vmmov 0   ;;  %vm822_vm2 = vcmask 1042432  }
  0x58   : > { %s1609_s26 = scalar_select %p293_p6, %s1471_s22, 1  ;;  %1263 = vset.pattern.permute.xlu0 %v1417_v1  ;;  %323 = vmatprep.subr.mxu0 %v306_v2  ;;  %v309_v8 = vld [vmem:[#allocation2 + $0x20] sm:$0xff]  ;;  %v311_v9 = vld [vmem:[#allocation2 + $0x30] sm:$0xff] }
  0x59   : > { %394 = vmatprep.subr.mxu1 %v308_v3  ;;  %324 = vmatpush1.msra.mxu0 %v305_v4  ;;  %s1202_s16 = smul.u32 320, %s1471_s22  ;;  %s1033_s22 = scalar_lea.sflag [#allocation4], %s1595_s15 }
  0x5a   : > { %s1172_s13 = sshll.u32 %s1609_s26, 3  ;;  %395 = vmatpush1.msra.mxu1 %v307_v5  ;;  %465 = vmatprep.subr.mxu0 %v310_v7  ;;  %s1174_s6 = sshll.u32 %s1609_s26, 2 }
  0x5b   : > { %s296_s23 = scalar_lea.vmem %s1734_s2, %s1172_s13  ;;  %s300_s28 = scalar_lea.vmem %s1735_s3, %s1172_s13  ;;  %1189 = vmatprep.subr.mxu1 %v1416_v0 }
  0x5c   : > { %v312_v6 = vld [vmem:[%s296_s23] sm:$0xff]  ;;  %s304_s12 = scalar_lea.vmem %s1736_s4, %s1174_s6  ;;  %s292_s26 = scalar_lea.vmem [#allocation7], %s1201_s11 }
  0x5d   : > { %1175 = vmatmul.mubr.msk.f32.vlgmr.msra.gmra.mrb[0].mxu0 %vm319_vm0, %v312_v6  ;;  %1176 = vmatmul.mubr.msk.f32.vlgmr.msra.gmra.mrb[0].mxu1 %vm319_vm0, %v312_v6  ;;  %v313_v10 = vld [vmem:[%s300_s28] sm:$0xff]  ;;  %s1047_s13 = sshll.u32 %s292_s26, 4  ;;  %s1688_s17 = scalar_lea.hbm %s1737_s5, %s1202_s16  ;;  %s1690_s13 = int_to_ptr.vmem [resolvable:$true] %s1047_s13 }
  0x5e   : > { %466 = vmatpush1.msra.mxu0 %v309_v8  ;;  %529 = vmatprep.mubr.f32.mxu0 %v1416_v0  ;;  %v606_v19 = vld [vmem:[%s304_s12] sm:$0x7]  ;;  %s1342_s23 = scalar_lea.vmem %s1690_s13, 320  ;;  %s1419_s11 = smov [#allocation7]  }
  0x5f   : > { %1190 = vmatpush3.msra.mxu1 %v311_v9  ;;  %1191 = vmatprep.mubr.msk.f32.mxu1 %vm1418_vm1, %v1416_v0  ;;  %p1343_p9 = scmp.ne.s32.totalorder %s1690_s13, %s1342_s23  ;;  %s1346_s24 = sshll.u32 %s1419_s11, 4  ;;  %s1347_s24 = int_to_ptr.vmem [resolvable:$false] %s1346_s24 }
  0x60   : > { %316 = vperm.xlu0 %1263, %v313_v10   ;;  %s1348_s10 = scalar_lea.vmem %s1347_s24, 640  ;;  %p1349_p11 = scmp.lt.s32.totalorder %s1690_s13, %s1347_s24 }
  0x61   : > { %1177 = vmatmul.mubr.msk.f32.vlgmr.msra.gmra.mrb[2].mxu0 %vm319_vm0, %v312_v6  ;;  %1192 = vmatmul.mubr.msk.f32.vlgmr.msra.gmra.mrb[2].mxu1 %vm319_vm0, %v312_v6  ;;  %p1344_p12 = pnand %p1343_p9, %p1542_p8  ;;  %p1350_p5 = scmp.lt.s32.totalorder %s1348_s10, %s1342_s23 }
  0x62   : > { %674 = vmatprep.mubr.f32.mxu0 %v1416_v0  ;;  %745 = vmatprep.mubr.f32.mxu1 %v1416_v0 }
  0x63   : > { %p1345_p13 = pneg %p1344_p12  ;;  %p1351_p10 = por %p1350_p5, %p1349_p11 }
  0x65   : > { %p1352_p1 = pnand %p1351_p10, %p1345_p13 }
  0xdf   : > { %v317_v11 = vpop.permute.xlu0 %316 }
 0x130   : > { %v389_v12 = vpop.f32.mrb[0].mxu0  ;;  %v460_v13 = vpop.f32.mrb[0].mxu1 }
 0x131   : > { %v1627_v14 = vadd.f32 %v389_v12, %v317_v11  ;;  %v1629_v15 = vadd.f32 %v460_v13, %v317_v11  ;;  %v391_v16 = vpop.f32.mrb[1].mxu0  ;;  %v462_v17 = vpop.f32.mrb[1].mxu1 }
 0x132   : > { %v1631_v18 = vadd.f32 %v391_v16, %v317_v11  ;;  %v1640_v26 = vadd.f32 %v462_v17, %v317_v11 }
 0x133   : > { %610 = vmatprep.subr.mxu0 %v1629_v15 }
 0x134   : > { %v531_v20 = vpop.f32.mrb[2].mxu0  ;;  %v602_v21 = vpop.f32.mrb[2].mxu1  ;;  %611 = vmatpush1.msra.mxu0 %v1631_v18 }
 0x135   : > { %v1635_v22 = vadd.f32 %v531_v20, %v317_v11  ;;  %v1637_v23 = vadd.f32 %v602_v21, %v317_v11  ;;  %v533_v24 = vpop.f32.mrb[3].mxu0  ;;  %1179 = vmatmul.mubr.msk.f32.vlgmr.msra.gmra.mrb[4].mxu0 %vm319_vm0, %v606_v19  ;;  %1194 = vmatprep.subr.mxu0 %v1416_v0  ;;  %v1193_v25 = vpop.f32.mrb[3].mxu1 }
 0x136   : > { %v1642_v27 = vadd.f32 %v533_v24, %v317_v11  ;;  %1196 = vmatprep.mubr.msk.f32.mxu0 %vm1418_vm1, %v1416_v0 }
 0x137   : > { %681 = vmatprep.subr.mxu1 %v1635_v22 }
 0x138   : > { %682 = vmatpush1.msra.mxu1 %v1640_v26  ;;  %1195 = vmatpush3.msra.mxu0 %v1642_v27 }
 0x139   : > { %1180 = vmatmul.mubr.msk.f32.vlgmr.msra.gmra.mrb[4].mxu1 %vm319_vm0, %v606_v19  ;;  %1197 = vmatmul.mubr.msk.f32.vlgmr.msra.gmra.mrb[6].mxu0 %vm319_vm0, %v606_v19 }
 0x208   : > { %v676_v28 = vpop.f32.mrb[4].mxu0 }
 0x209   : > { %v823_v29 = vsel %vm822_vm2, %v676_v28, -inf  ;;  %v678_v30 = vpop.f32.mrb[5].mxu0 }
 0x20a   : > { %v824_v31 = vrot.slane %v823_v29, 4  ;;  %v830_v32 = vsel %vm822_vm2, %v678_v30, -inf }
 0x20b   : > { %v831_v33 = vrot.slane %v830_v32, 4 }
 0x20c   : > { %v825_v34 = vmax.f32 %v823_v29, %v824_v31  ;;  %v747_v35 = vpop.f32.mrb[4].mxu1  ;;  %v818_v36 = vpop.f32.mrb[6].mxu0 }
 0x20d   : > { %v832_v37 = vmax.f32 %v830_v32, %v831_v33  ;;  %v837_v38 = vsel %vm822_vm2, %v747_v35, -inf  ;;  %v851_v39 = vsel %vm822_vm2, %v818_v36, -inf  ;;  %v749_v40 = vpop.f32.mrb[5].mxu1  ;;  %v1198_v41 = vpop.f32.mrb[7].mxu0 }
 0x20e   : > { %v826_v42 = vrot.slane %v825_v34, 2  ;;  %v838_v43 = vrot.slane %v837_v38, 4  ;;  %v852_v44 = vrot.slane %v851_v39, 4  ;;  %v844_v45 = vsel %vm822_vm2, %v749_v40, -inf }
 0x20f   : > { %v833_v46 = vrot.slane %v832_v37, 2  ;;  %v845_v47 = vrot.slane %v844_v45, 4 }
 0x210   : > { %v827_v48 = vmax.f32 %v825_v34, %v826_v42  ;;  %v839_v49 = vmax.f32 %v837_v38, %v838_v43  ;;  %v853_v50 = vmax.f32 %v851_v39, %v852_v44 }
 0x211   : > { %v834_v51 = vmax.f32 %v832_v37, %v833_v46  ;;  %v846_v52 = vmax.f32 %v844_v45, %v845_v47 }
 0x212   : > { %v828_v53 = vrot.slane %v827_v48, 1  ;;  %v840_v54 = vrot.slane %v839_v49, 2  ;;  %v854_v55 = vrot.slane %v853_v50, 2 }
 0x213   : > { %v835_v56 = vrot.slane %v834_v51, 1  ;;  %v847_v57 = vrot.slane %v846_v52, 2 }
 0x214   : > { %v829_v58 = vmax.f32 %v827_v48, %v828_v53  ;;  %v841_v59 = vmax.f32 %v839_v49, %v840_v54  ;;  %v855_v60 = vmax.f32 %v853_v50, %v854_v55 }
 0x215   : > { %v836_v61 = vmax.f32 %v834_v51, %v835_v56  ;;  %v848_v62 = vmax.f32 %v846_v52, %v847_v57  ;;  %v921_v57 = vlaneseq }
 0x216   : > { %v858_v63 = vsub.f32 %v676_v28, %v829_v58  ;;  %v842_v0 = vrot.slane %v841_v59, 1  ;;  %v856_v1 = vrot.slane %v855_v60, 1 }
 0x217   : > { %v859_v2 = vsub.f32 %v678_v30, %v836_v61  ;;  %v849_v3 = vrot.slane %v848_v62, 1 }
 0x218   : > { %v863_v4 = vmul.f32 1.442695, %v858_v63  ;;  %v843_v5 = vmax.f32 %v841_v59, %v842_v0  ;;  %v857_v6 = vmax.f32 %v855_v60, %v856_v1  ;;  %v922_v63 = vshrl.u32 %v921_v57, 7 }
 0x219   : > { %v865_v7 = vmul.f32 1.442695, %v859_v2  ;;  %v850_v8 = vmax.f32 %v848_v62, %v849_v3 }
 0x21a   : > { %1264 = vpow2.f32 %v863_v4  ;;  %v860_v9 = vsub.f32 %v747_v35, %v843_v5  ;;  %v862_v10 = vsub.f32 %v818_v36, %v857_v6  ;;  %v923_v0 = vsub.s32 0, %v922_v63 }
 0x21b   : > { %1266 = vpow2.f32 %v865_v7  ;;  %v861_v11 = vsub.f32 %v749_v40, %v850_v8  ;;  %v959_v1 = vsub.s32 1, %v922_v63  ;;  %v995_v2 = vsub.s32 2, %v922_v63 }
 0x21c   : > { %v867_v12 = vmul.f32 1.442695, %v860_v9  ;;  %v871_v13 = vmul.f32 1.442695, %v862_v10 }
 0x21d   : > { %v869_v16 = vmul.f32 1.442695, %v861_v11 }
 0x21e   : > { %1268 = vpow2.f32 %v867_v12 }
 0x21f   : > { %1270 = vpow2.f32 %v871_v13 }
 0x220   : > { %1272 = vpow2.f32 %v869_v16 }
 0x224   : > { %v1265_v17 = vpop.eup %1264 }
 0x225   : > { %v1267_v19 = vpop.eup %1266  ;;  %v873_v20 = vsel %vm822_vm2, %v1265_v17, 0.0 }
 0x226   : > { %v874_v21 = vrot.slane %v873_v20, 4  ;;  %v880_v24 = vsel %vm822_vm2, %v1267_v19, 0.0 }
 0x227   : > { %v881_v25 = vrot.slane %v880_v24, 4 }
 0x228   : > { %v1269_v28 = vpop.eup %1268  ;;  %v875_v29 = vadd.f32 %v874_v21, %v873_v20 }
 0x229   : > { %v1271_v30 = vpop.eup %1270  ;;  %v882_v31 = vadd.f32 %v881_v25, %v880_v24  ;;  %v887_v32 = vsel %vm822_vm2, %v1269_v28, 0.0 }
 0x22a   : > { %v1658_v33 = vpop.eup %1272  ;;  %v876_v34 = vrot.slane %v875_v29, 2  ;;  %v888_v35 = vrot.slane %v887_v32, 4  ;;  %v901_v36 = vsel %vm822_vm2, %v1271_v30, 0.0 }
 0x22b   : > { %v883_v37 = vrot.slane %v882_v31, 2  ;;  %v902_v38 = vrot.slane %v901_v36, 4  ;;  %v894_v39 = vsel %vm822_vm2, %v1658_v33, 0.0 }
 0x22c   : > { %v877_v40 = vadd.f32 %v876_v34, %v875_v29  ;;  %v889_v41 = vadd.f32 %v888_v35, %v887_v32  ;;  %v895_v42 = vrot.slane %v894_v39, 4 }
 0x22d   : > { %v884_v43 = vadd.f32 %v883_v37, %v882_v31  ;;  %v903_v44 = vadd.f32 %v902_v38, %v901_v36 }
 0x22e   : > { %v878_v45 = vrot.slane %v877_v40, 1  ;;  %v890_v46 = vrot.slane %v889_v41, 2  ;;  %v896_v47 = vadd.f32 %v895_v42, %v894_v39 }
 0x22f   : > { %v885_v48 = vrot.slane %v884_v43, 1  ;;  %v904_v49 = vrot.slane %v903_v44, 2 }
 0x230   : > { %v879_v50 = vadd.f32 %v878_v45, %v877_v40  ;;  %v891_v51 = vadd.f32 %v890_v46, %v889_v41  ;;  %v897_v52 = vrot.slane %v896_v47, 2 }
 0x231   : > { %v886_v53 = vadd.f32 %v885_v48, %v884_v43  ;;  %v905_v54 = vadd.f32 %v904_v49, %v903_v44 }
 0x232   : > { %1274 = vrcp.f32 %v879_v50  ;;  %v892_v55 = vrot.slane %v891_v51, 1  ;;  %v898_v56 = vadd.f32 %v897_v52, %v896_v47 }
 0x233   : > { %1276 = vrcp.f32 %v886_v53  ;;  %v906_v58 = vrot.slane %v905_v54, 1 }
 0x234   : > { %v893_v59 = vadd.f32 %v892_v55, %v891_v51  ;;  %v899_v60 = vrot.slane %v898_v56, 1  ;;  %v919_v51 = vld [vmem:[%s1601_s8 + $0x8] sm:$0xff] }
 0x235   : > { %v907_v61 = vadd.f32 %v906_v58, %v905_v54 }
 0x236   : > { %1278 = vrcp.f32 %v893_v59  ;;  %v900_v62 = vadd.f32 %v899_v60, %v898_v56 }
 0x237   : > { %1280 = vrcp.f32 %v907_v61 }
 0x238   : > { %1282 = vrcp.f32 %v900_v62 }
 0x23c   : > { %v1275_v3 = vpop.eup %1274 }
 0x23d   : > { %v1277_v4 = vpop.eup %1276  ;;  %v913_v5 = vmul.f32 %v1275_v3, %v1265_v17 }
 0x23e   : > { %v914_v6 = vmul.f32 %v1277_v4, %v1267_v19 }
 0x23f   : > { %v924_v7 = vrot.slane %v913_v5, %v923_v0  ;;  %v960_v8 = vrot.slane %v913_v5, %v959_v1  ;;  %v996_v9 = vrot.slane %v913_v5, %v995_v2 }
 0x240   : > { %v1279_v10 = vpop.eup %1278  ;;  %v928_v11 = vrot.slane %v914_v6, %v923_v0  ;;  %v964_v12 = vrot.slane %v914_v6, %v959_v1  ;;  %v1000_v13 = vrot.slane %v914_v6, %v995_v2 }
 0x241   : > { %v1281_v16 = vpop.eup %1280  ;;  %v941_v20 = vmul.f32 %v924_v7, %v1627_v14  ;;  %v977_v21 = vmul.f32 %v960_v8, %v1631_v18  ;;  %v915_v24 = vmul.f32 %v1279_v10, %v1269_v28  ;;  %v1013_v25 = vmul.f32 %v996_v9, %v1629_v15  ;;  %v918_v14 = vld [vmem:[%s1601_s8] sm:$0xff] }
 0x242   : > { %v1283_v29 = vpop.eup %1282  ;;  %v942_v17 = vmul.f32 %v928_v11, %v1631_v18  ;;  %v978_v19 = vmul.f32 %v964_v12, %v1629_v15  ;;  %v917_v31 = vmul.f32 %v1281_v16, %v1271_v30  ;;  %v1014_v32 = vmul.f32 %v1000_v13, %v1640_v26  ;;  %v920_v30 = vld [vmem:[%s1601_s8 + $0x10] sm:$0xf] }
 0x243   : > { %v932_v34 = vrot.slane %v915_v24, %v923_v0  ;;  %v968_v35 = vrot.slane %v915_v24, %v959_v1  ;;  %v1004_v36 = vrot.slane %v915_v24, %v995_v2  ;;  %v916_v37 = vmul.f32 %v1283_v29, %v1658_v33 }
 0x244   : > { %v940_v38 = vrot.slane %v917_v31, %v923_v0  ;;  %v976_v39 = vrot.slane %v917_v31, %v959_v1  ;;  %v1012_v28 = vrot.slane %v917_v31, %v995_v2  ;;  %v950_v40 = vcombine.low %v941_v20, %v942_v17 }
 0x245   : > { %v943_v41 = vmul.f32 %v932_v34, %v1629_v15  ;;  %v979_v18 = vmul.f32 %v968_v35, %v1640_v26  ;;  %v936_v42 = vrot.slane %v916_v37, %v923_v0  ;;  %v972_v43 = vrot.slane %v916_v37, %v959_v1 }
 0x246   : > { %v945_v44 = vmul.f32 %v940_v38, %v1635_v22  ;;  %v1008_v45 = vrot.slane %v916_v37, %v995_v2  ;;  %v954_v46 = vadd.f32 %v950_v40, %v918_v14  ;;  %v981_v47 = vmul.f32 %v976_v39, %v1642_v27 }
 0x247   : > { %v944_v33 = vmul.f32 %v936_v42, %v1640_v26  ;;  %v980_v48 = vmul.f32 %v972_v43, %v1635_v22  ;;  %v986_v49 = vcombine.low %v977_v21, %v978_v19  ;;  %v1015_v15 = vmul.f32 %v1004_v36, %v1635_v22 }
 0x248   : > { %v1016_v50 = vmul.f32 %v1008_v45, %v1642_v27  ;;  %v956_v52 = vadd.f32 %v945_v44, %v920_v30  ;;  %v1017_v53 = vmul.f32 %v1012_v28, %v1637_v23  ;;  %v1022_v54 = vcombine.low %v1013_v25, %v1014_v32 }
 0x249   : > { %v951_v55 = vcombine.low %v943_v41, %v944_v33  ;;  %v987_v56 = vcombine.low %v979_v18, %v980_v48  ;;  %v990_v57 = vadd.f32 %v986_v49, %v954_v46 }
 0x24a   : > { %v992_v58 = vadd.f32 %v981_v47, %v956_v52  ;;  %v1023_v26 = vcombine.low %v1015_v15, %v1016_v50 }
 0x24b   : > { %v955_v59 = vadd.f32 %v951_v55, %v919_v51  ;;  %v1026_v60 = vadd.f32 %v1022_v54, %v990_v57 }
 0x24c   : > { %v1028_v61 = vadd.f32 %v1017_v53, %v992_v58 }
 0x24d   : > { %v991_v22 = vadd.f32 %v987_v56, %v955_v59  ;;  %1029 = vst [vmem:[%s292_s26] sm:$0xff] %v1026_v60 }
 0x24e   : > { %1031 = vst [vmem:[%s292_s26 + $0x10] sm:$0xf] %v1028_v61 }
 0x24f   : > { %v1027_v27 = vadd.f32 %v1023_v26, %v991_v22 }
 0x251   : > { %1030 = vst [vmem:[%s292_s26 + $0x8] sm:$0xff] %v1027_v27 }
 0x252   : > { %1355 = shalt.err (!%p1352_p1)
}
 0x253   : > { %s1356_s15 = scalar_lea.hbm %s1688_s17, 320  ;;  %s1360_s9 = scalar_lea.hbm %s1737_s5, 640 }
 0x254   : > { %p1357_p2 = scmp.ne.s32.totalorder %s1688_s17, %s1356_s15  ;;  %p1361_p4 = scmp.lt.u32.totalorder %s1688_s17, %s1737_s5 }
 0x255   : > { %p1362_p0 = scmp.lt.u32.totalorder %s1360_s9, %s1356_s15  ;;  %p1364_p9 = scmp.lt.u32.totalorder %s1356_s15, %s1688_s17 }
 0x256   : > { %p1358_p7 = pnand %p1357_p2, %p1542_p8 }
 0x257   : > { %p1363_p6 = por %p1362_p0, %p1361_p4 }
 0x258   : > { %p1359_p3 = pneg %p1358_p7 }
 0x259   : > { %p1365_p12 = por %p1364_p9, %p1363_p6 }
 0x25b   : > { %p1366_p13 = pnand %p1365_p12, %p1359_p3 }
 0x25d   : > { %1369 = shalt.err (!%p1366_p13)
}
 0x25e   : > { %1209 = dma.vmem_to_hbm [thread:$0]  (%p1542_p8), %s1690_s13, 320, %s1688_s17, %s1033_s22  }
 0x25f PF: > { %s1059_s16 = sand.u32 1, %s1400_s18   ;;  %p1756_p11 = scmp.ne.s32.totalorder %s1742_s25, 0 }
 0x260   : > { %p1757_p5 = scmp.ge.s32.totalorder %s1412_s21, 2  ;;  %s1060_s26 = scalar_lea.sflag [#allocation4], %s1059_s16 }
 0x262   : > { %p1220_p10 = pnand %p1757_p5, %p1756_p11 }
 0x264   : > { %1395 = dma.done.wait (!%p1220_p10), %s1060_s26, 320  }
 0x265   : > { %1397 = vsyncadd (!%p1220_p10), %s1060_s26, 4294966976  ;;  %p19_p1 = scmp.ge.s32.totalorder %s1498_s29, 4   ;;  %s1758_s18 = smov %s1404_s19 }
 0x266   : > { %s1759_s19 = smov %s1408_s20  ;;  %s1760_s20 = smov %s1534_s27 }
 0x267   : > { %s1761_s21 = smov %s1498_s29  ;;  %21 = sbr.rel (!%p19_p1) target bundleno = 6 (0x6), region = 99 }
 0x26e   :  { %1065 = vsyncpa [#allocation3], 1 }
 0x26f   :  { %1067 = vsyncpa [#allocation3 + $0x1], 1 }
 0x270   :  { %1068 = vsyncpa [#allocation6], 1 }
 0x271   :  { %1070 = vsyncpa [#allocation6 + $0x1], 1 }
 0x272   :  { %1071 = vsyncpa [#allocation4], 1 }
 0x273   :  { %1073 = vsyncpa [#allocation4 + $0x1], 1 }

</bundles_post_ra>
